<compile_context>
chip_gen: v5e
topology: v5e:2x2
jax: 0.10.0
libtpu: 0.0.40
codegen_flags: <defaults>
</compile_context>

<pallas_src>
import functools

import jax
import jax.numpy as jnp
from jax import lax
from jax.experimental import pallas as pl
from jax.experimental.pallas import tpu as pltpu


def _fused_conditioning_kernel(x_ref, params_ref, logits_ref,
                               text_out_ref, cond_out_ref, *, dcon):
    """Single-invocation fused conditioning kernel.

    x_ref        : (B, S, Din)          valid (un-padded) conditioning rows
    params_ref   : (R, Dcon+Dpos)       packed constants:
                                          rows [0,Din)  lanes [0,Dcon)      -> Linear weight W
                                          row  Din      lanes [0,Dcon)      -> Linear bias
                                          rows [0,Lmax) lanes [Dcon,Dcon+Dpos) -> pos rows 1..Lmax
    logits_ref   : (B, S, T)            pLM logits
    text_out_ref : (B, Lmax, Dcon+Dpos) text_embeds
    cond_out_ref : (B, T, S)            softmax(logits, dim=T), transposed
    """
    B, S, Din = x_ref.shape
    _, Lmax, Dtot = text_out_ref.shape
    dpos = Dtot - dcon
    T = logits_ref.shape[2]

    params = params_ref[...]                                 # (R, Dcon+Dpos), single DMA
    bias = params[Din:Din + 1, 0:dcon]                       # (1, Dcon)
    pos = params[0:Lmax, dcon:Dtot]                          # (Lmax, Dpos), lane-aligned slice

    # ---- text_con_embeds = Linear(x) -------------------------------------
    # K = Din (=3) is tiny: unrolled VPU multiply-accumulate instead of an MXU matmul.
    x = x_ref[...]                                           # (B, S, Din)
    proj = x[:, :, 0:1] * params[0:1, 0:dcon][None]          # (B,S,1)*(1,1,Dcon)
    for k in range(1, Din):                                  # static unroll
        proj = proj + x[:, :, k:k + 1] * params[k:k + 1, 0:dcon][None]
    proj = proj + bias[None]                                 # (B, S, Dcon)

    # ---- text_embeds = cat([zero-pad(proj), pos_emb], dim=-1) -------------
    # PyTorch zero-pads AFTER the Linear, so pad rows are exactly 0 (not bias).
    # Lane-concat at the vreg-aligned 256 boundary (free), then two row-disjoint full-width
    # stores: one for the S valid rows, one for the zero-padded tail rows.
    pos_b = jnp.broadcast_to(pos[None], (B, Lmax, dpos))
    text_out_ref[:, :S, :] = jnp.concatenate([proj, pos_b[:, :S, :]], axis=-1)
    if S < Lmax:                                             # static
        pad = jnp.zeros((B, Lmax - S, dcon), proj.dtype)
        text_out_ref[:, S:, :] = jnp.concatenate([pad, pos_b[:, S:, :]], axis=-1)

    # ---- cond_images_embeds = rearrange(softmax(logits, dim=2), 'b s t -> b t s')
    logits = logits_ref[...]                                 # (B, S, T)
    m = jnp.max(logits, axis=-1, keepdims=True)
    e = jnp.exp(logits - m)
    probs = e / jnp.sum(e, axis=-1, keepdims=True)           # exact softmax (no approx recip)

    # Fused transpose on the otherwise-idle MXU: one *batched* identity contraction
    # (eye_T[b] contracted with probs[b] over T) -> (B, T, S).  precision=HIGHEST keeps the
    # f32 probabilities from being rounded through a single bf16 pass.
    rows = lax.broadcasted_iota(jnp.int32, (T, T), 0)
    cols = lax.broadcasted_iota(jnp.int32, (T, T), 1)
    eye_t = (rows == cols).astype(probs.dtype)               # (T, T), generated in-kernel
    eye_b = jnp.broadcast_to(eye_t[None], (B, T, T))
    cond_out_ref[...] = lax.dot_general(
        eye_b, probs,
        dimension_numbers=(((2,), (2,)), ((0,), (0,))),      # contract T with T, batch on B
        precision=lax.Precision.HIGHEST,
        preferred_element_type=jnp.float32)                  # (B, T, S)


class ProteinPredictorBase:
    """JAX/Pallas re-implementation of the tensor math in ProteinPredictor_Base.forward()."""

    def __init__(self, key, *, text_embed_input_dim=3, text_con_embed_dim=256,
                 text_pos_embed_dim=32, text_max_len=16):
        k1, k2, k3 = jax.random.split(key, 3)
        self.text_embed_input_dim = text_embed_input_dim
        self.text_con_embed_dim = text_con_embed_dim
        self.text_pos_embed_dim = text_pos_embed_dim
        self.text_max_len = text_max_len
        self.text_embed_dim = text_con_embed_dim + text_pos_embed_dim

        # nn.Linear(text_embed_input_dim, text_con_embed_dim)
        self.W = 0.02 * jax.random.normal(
            k1, (text_embed_input_dim, text_con_embed_dim), jnp.float32)
        self.bias = 0.02 * jax.random.normal(k2, (text_con_embed_dim,), jnp.float32)
        # nn.Embedding(text_max_len + 1, text_pos_embed_dim)
        self.pos_table = 0.02 * jax.random.normal(
            k3, (text_max_len + 1, text_pos_embed_dim), jnp.float32)
        # text_pos_matrix_i = [1, 2, ..., text_max_len]; fixed indices -> static slice at init.
        self.text_pos_matrix_i = jnp.arange(1, text_max_len + 1, dtype=jnp.int32)
        self.pos_emb = self.pos_table[1:text_max_len + 1]    # (Lmax, Dpos)

        # Pack ALL constant operands into one slab so the grid-less, latency-bound kernel
        # issues 3 input DMAs (x, params, logits) instead of 5.
        rows = max(text_embed_input_dim + 1, text_max_len)
        params = jnp.zeros((rows, self.text_embed_dim), jnp.float32)
        params = params.at[:text_embed_input_dim, :text_con_embed_dim].set(self.W)
        params = params.at[text_embed_input_dim, :text_con_embed_dim].set(self.bias)
        params = params.at[:text_max_len, text_con_embed_dim:].set(self.pos_emb)
        self.params = params

    def forward(self, seq_objs, text_con_hidden, plm_logits):
        """
        seq_objs        : (B, C, L)     main diffusion object (pass-through)
        text_con_hidden : (B, S, Din)   stands in for the (frozen) pLM hidden state
                                        after rearrange('b m n -> b n m')
        plm_logits      : (B, S, T)     stands in for the pLM logits
        """
        B, S, Din = text_con_hidden.shape
        assert Din == self.text_embed_input_dim
        # NOTE: S is baked into the kernel as a static slice bound (a new S recompiles);
        # it must never be a traced value.
        assert S <= self.text_max_len, 'text_embed length is larger than text_max_len'
        Bt, St, T = plm_logits.shape
        assert (Bt, St) == (B, S)
        Lmax = self.text_max_len
        Dcon, Dpos = self.text_con_embed_dim, self.text_pos_embed_dim

        vmem_full = pl.BlockSpec(memory_space=pltpu.MemorySpace.VMEM)
        kernel = functools.partial(_fused_conditioning_kernel, dcon=Dcon)
        # Grid-less single invocation: whole working set is ~40 KiB, well under every
        # generation's VMEM (incl. v7x's 64 MiB / 32 MiB scoped default).
        # TODO(synk): if B/S grow to production ESM lengths, add a grid over B (and S tiles)
        # with dimension_semantics=("parallel", ...) so v7x's two TensorCores split the work
        # and DMA/compute overlap via the BlockSpec pipeline.
        text_embeds, cond_images_embeds = pl.pallas_call(
            kernel,
            out_shape=(
                jax.ShapeDtypeStruct((B, Lmax, Dcon + Dpos), jnp.float32),
                jax.ShapeDtypeStruct((B, T, S), jnp.float32),
            ),
            in_specs=[vmem_full, vmem_full, vmem_full],
            out_specs=(vmem_full, vmem_full),
        )(text_con_hidden, self.params, plm_logits)

        seq_objs_embeds = seq_objs  # forward: seq_objs_embeds = seq_objs

        # TODO(synk): self.diffuser_core(seq_objs_embeds, text_embeds, cond_images_embeds)
        # (ElucidatedImagen_OneD diffusion loss over an external UNet) and the frozen ESM
        # protein language model have no clean standalone Pallas equivalent; we return the
        # conditioning tensors that would be fed to the diffuser instead.
        return seq_objs_embeds, text_embeds, cond_images_embeds


def _reference_forward(model, seq_objs, text_con_hidden, plm_logits):
    """Pure-JAX reference mirroring the PyTorch math, for correctness checking."""
    B, S, _ = text_con_hidden.shape
    Lmax = model.text_max_len
    proj = jnp.einsum('bsd,dc->bsc', text_con_hidden, model.W) + model.bias
    proj_padded = jnp.zeros((B, Lmax, model.text_con_embed_dim), jnp.float32)
    proj_padded = proj_padded.at[:, :S, :].set(proj)
    pos = jnp.take(model.pos_table, model.text_pos_matrix_i, axis=0)
    pos = jnp.broadcast_to(pos[None], (B, Lmax, model.text_pos_embed_dim))
    text_embeds = jnp.concatenate([proj_padded, pos], axis=-1)
    norm = jax.nn.softmax(plm_logits, axis=2)
    cond = jnp.transpose(norm, (0, 2, 1))
    return seq_objs, text_embeds, cond


if __name__ == "__main__":
    key = jax.random.PRNGKey(0)
    k_model, k_seq, k_hid, k_log = jax.random.split(key, 4)

    # Small, module-consistent shapes.
    B, C, L_obj = 2, 4, 64           # seq_objs: (batch, unet.channels, seq_obj_max_size)
    S, Din, T = 12, 3, 33            # pLM seq len, text_embed_input_dim, alphabet size

    model = ProteinPredictorBase(
        k_model,
        text_embed_input_dim=Din,
        text_con_embed_dim=256,
        text_pos_embed_dim=32,
        text_max_len=16,
    )

    seq_objs = jax.random.normal(k_seq, (B, C, L_obj), jnp.float32)
    text_con_hidden = jax.random.normal(k_hid, (B, S, Din), jnp.float32)
    plm_logits = jax.random.normal(k_log, (B, S, T), jnp.float32)

    outs = model.forward(seq_objs, text_con_hidden, plm_logits)
    outs = jax.block_until_ready(outs)

    refs = _reference_forward(model, seq_objs, text_con_hidden, plm_logits)
    # seq pass-through is exact; text_embeds is f32 VPU math; the transposed softmax now uses
    # the exact reciprocal + HIGHEST-precision identity contraction, so its tolerance is
    # tightened 1e-2 -> 1e-3 (observed error is ~1e-6).
    tols = (1e-6, 1e-5, 1e-3)
    for o, r, tol in zip(outs, refs, tols):
        assert o.shape == r.shape, (o.shape, r.shape)
        assert jnp.max(jnp.abs(o - r)) < tol, float(jnp.max(jnp.abs(o - r)))

    print("KERNEL_OK")
</pallas_src>

<mosaic_0001>
module attributes {stable_mosaic.version = 11 : i64} {
  func.func @_fused_conditioning_kernel(%arg0: memref<2x12x3xf32, #tpu.memory_space<vmem>>, %arg1: memref<16x288xf32, #tpu.memory_space<vmem>>, %arg2: memref<2x12x33xf32, #tpu.memory_space<vmem>>, %arg3: memref<2x16x288xf32, #tpu.memory_space<vmem>>, %arg4: memref<2x33x12xf32, #tpu.memory_space<vmem>>) attributes {dimension_semantics = [], scalar_prefetch = 0 : i64, scratch_operands = 0 : i64, tpu.core_type = #tpu.core_type<tc>} {
    %c0 = arith.constant 0 : index
    %c0_0 = arith.constant 0 : index
    %0 = vector.load %arg1[%c0, %c0_0] : memref<16x288xf32, #tpu.memory_space<vmem>>, vector<16x288xf32>
    %1 = vector.extract_strided_slice %0 {offsets = [3, 0], sizes = [1, 256], strides = [1, 1]} : vector<16x288xf32> to vector<1x256xf32>
    %2 = vector.extract_strided_slice %0 {offsets = [0, 256], sizes = [16, 32], strides = [1, 1]} : vector<16x288xf32> to vector<16x32xf32>
    %c0_1 = arith.constant 0 : index
    %c0_2 = arith.constant 0 : index
    %c0_3 = arith.constant 0 : index
    %3 = vector.load %arg0[%c0_1, %c0_2, %c0_3] : memref<2x12x3xf32, #tpu.memory_space<vmem>>, vector<2x12x3xf32>
    %4 = vector.extract_strided_slice %3 {offsets = [0, 0, 0], sizes = [2, 12, 1], strides = [1, 1, 1]} : vector<2x12x3xf32> to vector<2x12x1xf32>
    %5 = vector.extract_strided_slice %0 {offsets = [0, 0], sizes = [1, 256], strides = [1, 1]} : vector<16x288xf32> to vector<1x256xf32>
    %6 = vector.shape_cast %5 : vector<1x256xf32> to vector<1x1x256xf32>
    %7 = vector.broadcast %4 : vector<2x12x1xf32> to vector<2x12x256xf32>
    %8 = vector.broadcast %6 : vector<1x1x256xf32> to vector<2x12x256xf32>
    %9 = arith.mulf %7, %8 : vector<2x12x256xf32>
    %10 = vector.extract_strided_slice %3 {offsets = [0, 0, 1], sizes = [2, 12, 1], strides = [1, 1, 1]} : vector<2x12x3xf32> to vector<2x12x1xf32>
    %11 = vector.extract_strided_slice %0 {offsets = [1, 0], sizes = [1, 256], strides = [1, 1]} : vector<16x288xf32> to vector<1x256xf32>
    %12 = vector.shape_cast %11 : vector<1x256xf32> to vector<1x1x256xf32>
    %13 = vector.broadcast %10 : vector<2x12x1xf32> to vector<2x12x256xf32>
    %14 = vector.broadcast %12 : vector<1x1x256xf32> to vector<2x12x256xf32>
    %15 = arith.mulf %13, %14 : vector<2x12x256xf32>
    %16 = arith.addf %9, %15 : vector<2x12x256xf32>
    %17 = vector.extract_strided_slice %3 {offsets = [0, 0, 2], sizes = [2, 12, 1], strides = [1, 1, 1]} : vector<2x12x3xf32> to vector<2x12x1xf32>
    %18 = vector.extract_strided_slice %0 {offsets = [2, 0], sizes = [1, 256], strides = [1, 1]} : vector<16x288xf32> to vector<1x256xf32>
    %19 = vector.shape_cast %18 : vector<1x256xf32> to vector<1x1x256xf32>
    %20 = vector.broadcast %17 : vector<2x12x1xf32> to vector<2x12x256xf32>
    %21 = vector.broadcast %19 : vector<1x1x256xf32> to vector<2x12x256xf32>
    %22 = arith.mulf %20, %21 : vector<2x12x256xf32>
    %23 = arith.addf %16, %22 : vector<2x12x256xf32>
    %24 = vector.shape_cast %1 : vector<1x256xf32> to vector<1x1x256xf32>
    %25 = vector.broadcast %24 : vector<1x1x256xf32> to vector<2x12x256xf32>
    %26 = arith.addf %23, %25 : vector<2x12x256xf32>
    %27 = vector.shape_cast %2 : vector<16x32xf32> to vector<1x16x32xf32>
    %28 = vector.shape_cast %27 : vector<1x16x32xf32> to vector<1x16x32xf32>
    %29 = vector.broadcast %28 : vector<1x16x32xf32> to vector<2x16x32xf32>
    %30 = vector.extract_strided_slice %29 {offsets = [0, 0, 0], sizes = [2, 12, 32], strides = [1, 1, 1]} : vector<2x16x32xf32> to vector<2x12x32xf32>
    %31 = tpu.concatenate %26, %30 in 2 : vector<2x12x256xf32>, vector<2x12x32xf32> -> vector<2x12x288xf32>
    %c0_4 = arith.constant 0 : index
    %c0_5 = arith.constant 0 : index
    %c0_6 = arith.constant 0 : index
    %32 = vector.load %arg3[%c0_4, %c0_5, %c0_6] : memref<2x16x288xf32, #tpu.memory_space<vmem>>, vector<2x12x288xf32>
    tpu.vector_store %arg3[%c0_4, %c0_5, %c0_6], %31 {strides = array<i32>} : memref<2x16x288xf32, #tpu.memory_space<vmem>>, vector<2x12x288xf32>,
    %cst = arith.constant 0.000000e+00 : f32
    %33 = vector.broadcast %cst : f32 to vector<2x4x256xf32>
    %34 = vector.extract_strided_slice %29 {offsets = [0, 12, 0], sizes = [2, 4, 32], strides = [1, 1, 1]} : vector<2x16x32xf32> to vector<2x4x32xf32>
    %35 = tpu.concatenate %33, %34 in 2 : vector<2x4x256xf32>, vector<2x4x32xf32> -> vector<2x4x288xf32>
    %c0_7 = arith.constant 0 : index
    %c12 = arith.constant 12 : index
    %c0_8 = arith.constant 0 : index
    %36 = vector.load %arg3[%c0_7, %c12, %c0_8] : memref<2x16x288xf32, #tpu.memory_space<vmem>>, vector<2x4x288xf32>
    tpu.vector_store %arg3[%c0_7, %c12, %c0_8], %35 {strides = array<i32>} : memref<2x16x288xf32, #tpu.memory_space<vmem>>, vector<2x4x288xf32>,
    %c0_9 = arith.constant 0 : index
    %c0_10 = arith.constant 0 : index
    %c0_11 = arith.constant 0 : index
    %37 = vector.load %arg2[%c0_9, %c0_10, %c0_11] : memref<2x12x33xf32, #tpu.memory_space<vmem>>, vector<2x12x33xf32>
    %cst_12 = arith.constant dense<0xFF800000> : vector<2x12xf32>
    %38 = vector.multi_reduction <maximumf>, %37, %cst_12 [2] : vector<2x12x33xf32> to vector<2x12xf32>
    %39 = vector.shape_cast %38 : vector<2x12xf32> to vector<2x12x1xf32>
    %40 = vector.broadcast %39 : vector<2x12x1xf32> to vector<2x12x33xf32>
    %41 = arith.subf %37, %40 : vector<2x12x33xf32>
    %42 = math.exp %41 : vector<2x12x33xf32>
    %cst_13 = arith.constant dense<0.000000e+00> : vector<2x12xf32>
    %43 = vector.multi_reduction <add>, %42, %cst_13 [2] : vector<2x12x33xf32> to vector<2x12xf32>
    %44 = vector.shape_cast %43 : vector<2x12xf32> to vector<2x12x1xf32>
    %45 = vector.broadcast %44 : vector<2x12x1xf32> to vector<2x12x33xf32>
    %46 = arith.divf %42, %45 : vector<2x12x33xf32>
    %47 = tpu.iota {dimensions = array<i32: 0>} : vector<33x33xi32>
    %48 = tpu.iota {dimensions = array<i32: 1>} : vector<33x33xi32>
    %49 = arith.cmpi eq, %47, %48 : vector<33x33xi32>
    %50 = arith.extui %49 : vector<33x33xi1> to vector<33x33xi32>
    %51 = arith.sitofp %50 : vector<33x33xi32> to vector<33x33xf32>
    %52 = vector.shape_cast %51 : vector<33x33xf32> to vector<1x33x33xf32>
    %53 = vector.shape_cast %52 : vector<1x33x33xf32> to vector<1x33x33xf32>
    %54 = vector.broadcast %53 : vector<1x33x33xf32> to vector<2x33x33xf32>
    %cst_14 = arith.constant dense<0.000000e+00> : vector<2x33x12xf32>
    %55 = tpu.matmul %54, %46, %cst_14 {dimension_numbers = #tpu.dot_dimension_numbers<[2], [2], [1], [1], [0, 0, 0, 1, 1, 1], [0], [0]>, precision = #tpu.contract_precision<fp32>} : vector<2x33x33xf32>, vector<2x12x33xf32>, vector<2x33x12xf32> -> vector<2x33x12xf32>
    %c0_15 = arith.constant 0 : index
    %c0_16 = arith.constant 0 : index
    %c0_17 = arith.constant 0 : index
    %56 = vector.load %arg4[%c0_15, %c0_16, %c0_17] : memref<2x33x12xf32, #tpu.memory_space<vmem>>, vector<2x33x12xf32>
    tpu.vector_store %arg4[%c0_15, %c0_16, %c0_17], %55 {strides = array<i32>} : memref<2x33x12xf32, #tpu.memory_space<vmem>>, vector<2x33x12xf32>,
    return
  }
}

</mosaic_0001>

<bundles_post_ra>
// kernel: tpu_custom_call.1
= control target key start
LH: loop header
LB: loop body
LE: loop exit
PB: predicated region body
PF: predicated region fallthrough
CT: control target
= control target key end

     0   :  { %vm169_vm0 = vcmask 265216   ;;  %s1470_s0 = inlined_call_operand.vmem [shape: f32[2,12,3], index: 0, kind: input, shape index: {}]   ;;  %s1471_s1 = inlined_call_operand.vmem [shape: f32[16,288], index: 1, kind: input, shape index: {}]   ;;  %s1472_s2 = inlined_call_operand.vmem [shape: f32[2,12,33], index: 2, kind: input, shape index: {}]   ;;  %s1473_s3 = inlined_call_operand.hbm [shape: f32[2,16,288], index: 3, kind: output, shape index: {0}]   ;;  %s1474_s4 = inlined_call_operand.vmem [shape: f32[2,33,12], index: 4, kind: output, shape index: {1}]  }
   0x1   :  { %v164_v0 = vld [vmem:[%s1472_s2 + $0x18] sm:$0xf]  ;;  %v162_v1 = vld [vmem:[%s1472_s2 + $0x8] sm:$0xf] }
   0x2   :  { %v176_v2 = vsel %vm169_vm0, %v164_v0, -inf  ;;  %v170_v3 = vsel %vm169_vm0, %v162_v1, -inf }
   0x3   :  { %10 = vsyncpa [#allocation3], 0  ;;  %177 = vmax.xlane.f32.xlu1 %v176_v2  ;;  %171 = vmax.xlane.f32.xlu0 %v170_v3  ;;  %v163_v4 = vld [vmem:[%s1472_s2 + $0x10] sm:$0xff]  ;;  %vm165_vm1 = vcmask 269312   ;;  %v161_v5 = vld [vmem:[%s1472_s2] sm:$0xff]  ;;  %v263_v28 = vlaneseq  ;;  %v1005_v33 = vmov 0.0  }
   0x4   :  { %v173_v6 = vsel %vm165_vm1, %v163_v4, -inf  ;;  %v166_v7 = vsel %vm165_vm1, %v161_v5, -inf  ;;  %v150_v34 = vrot.slane %v1005_v33, 4  ;;  %s1009_s2 = smov [#allocation2]   ;;  %s897_s26 = sshll.u32 %s1473_s3, 4  ;;  %s898_s26 = int_to_ptr.hbm [resolvable:$true] %s897_s26 }
   0x5   :  { %v1069_v29 = vshrl.u32 %v263_v28, 7  ;;  %v1071_v30 = vand.u32 127, %v263_v28  ;;  %s895_s23 = sshll.u32 %s1009_s2, 4  ;;  %s1011_s3 = smov 24   ;;  %s896_s23 = int_to_ptr.vmem [resolvable:$true] %s895_s23 }
   0x6   :  { %154 = vst [vmem:[#allocation2 + $0x18] sm:$0xf0] %v150_v34 }
   0x7   :  { %vm271_vm2 = vcmp.eq.s32.totalorder %v1069_v29, %v1071_v30  ;;  %155 = vst [vmem:[#allocation2 + $0x20] sm:$0xf0] %v150_v34  ;;  %v265_v49 = vadd.s32 8, %v1069_v29 }
   0x8   :  { %v1077_v35 = vsel %vm271_vm2, 1.0, %v1005_v33  ;;  %158 = vst [vmem:[#allocation2 + $0x48] sm:$0xf0] %v150_v34 }
   0x9   :  { %159 = vst [vmem:[#allocation2 + $0x50] sm:$0xf0] %v150_v34  ;;  %v287_v40 = vsel %vm165_vm1, %v1077_v35, 0  ;;  %vm272_vm10 = vcmp.eq.s32.totalorder %v265_v49, %v1071_v30 }
   0xa   :  { %v1094_v56 = vsub.f32 %v287_v40, %v287_v40 }
   0xb   :  { %174 = vmax.xlane.f32.xlu1 %v173_v6  ;;  %167 = vmax.xlane.f32.xlu0 %v166_v7 }
  0x76   :  { %v178_v8 = vpop.xlane.xlu1 %177  ;;  %v172_v9 = vpop.xlane.xlu0 %171 }
  0x77   :  { %v182_v10 = vsub.f32 %v164_v0, %v178_v8  ;;  %v180_v11 = vsub.f32 %v162_v1, %v172_v9 }
  0x79   :  { %v189_v12 = vmul.f32 1.442695, %v182_v10  ;;  %v185_v13 = vmul.f32 1.442695, %v180_v11  ;;  %v1108_v10 = vsel %vm272_vm10, 1.0, %v1005_v33  ;;  %vm139_vm10 = vcmask 257024  }
  0x7b   :  { %963 = vpow2.f32 %v189_v12 }
  0x7c   :  { %965 = vpow2.f32 %v185_v13 }
  0x7e   :  { %v175_v14 = vpop.xlane.xlu1 %174  ;;  %v168_v15 = vpop.xlane.xlu0 %167 }
  0x7f   :  { %v181_v16 = vsub.f32 %v163_v4, %v175_v14  ;;  %v179_v17 = vsub.f32 %v161_v5, %v168_v15 }
  0x81   :  { %v1053_v18 = vpop.eup %963  ;;  %v187_v19 = vmul.f32 1.442695, %v181_v16  ;;  %v183_v20 = vmul.f32 1.442695, %v179_v17 }
  0x82   :  { %v1055_v21 = vpop.eup %965  ;;  %v200_v22 = vsel %vm169_vm0, %v1053_v18, 0.0 }
  0x83   :  { %967 = vpow2.f32 %v187_v19  ;;  %v194_v23 = vsel %vm169_vm0, %v1055_v21, 0.0  ;;  %201 = vadd.xlane.f32.xlu0 %v200_v22 }
  0x84   :  { %969 = vpow2.f32 %v183_v20  ;;  %195 = vadd.xlane.f32.xlu2 %v194_v23 }
  0x89   :  { %v1061_v24 = vpop.eup %967 }
  0x8a   :  { %v1063_v25 = vpop.eup %969  ;;  %v197_v26 = vsel %vm165_vm1, %v1061_v24, 0.0 }
  0x8b   :  { %198 = vadd.xlane.f32.xlu1 %v197_v26  ;;  %v191_v27 = vsel %vm165_vm1, %v1063_v25, 0.0  ;;  %v1128_v26 = vand.u32 4294901760, %v1094_v56 }
  0x8c   :  { %192 = vadd.xlane.f32.xlu2 %v191_v27 }
  0xf6   :  { %v202_v31 = vpop.xlane.xlu0 %201 }
  0xf7   :  { %v196_v32 = vpop.xlane.xlu2 %195  ;;  %971 = vrcp.f32 %v202_v31  ;;  %vm253_vm3 = vweird.f32 %v202_v31  ;;  %v259_v42 = vand.u32 2147483648, %v202_v31  ;;  %v257_v45 = vand.u32 2147483647, %v202_v31 }
  0xf8   :  { %973 = vrcp.f32 %v196_v32  ;;  %v227_v47 = vand.u32 2147483647, %v196_v32  ;;  %v229_v48 = vand.u32 2147483648, %v196_v32  ;;  %vm223_vm7 = vweird.f32 %v196_v32 }
  0xf9   :  { %v260_v53 = vor.u32 1.1754944e-38, %v259_v42  ;;  %vm1090_vm8 = vcmp.eq.f32.partialorder %v257_v45, 8.507059e+37 }
  0xfa   :  { %vm228_vm9 = vcmp.eq.f32.partialorder %v227_v47, 8.507059e+37  ;;  %v230_v59 = vor.u32 1.1754944e-38, %v229_v48 }
  0xfd   :  { %v972_v36 = vpop.eup %971 }
  0xfe   :  { %v974_v37 = vpop.eup %973  ;;  %v249_v38 = vmul.f32 %v972_v36, %v202_v31  ;;  %v199_v39 = vpop.xlane.xlu1 %198  ;;  %vm254_vm4 = vweird.f32 %v972_v36 }
  0xff   :  { %v219_v41 = vmul.f32 %v974_v37, %v196_v32  ;;  %975 = vrcp.f32 %v199_v39  ;;  %v1081_v43 = vpop.xlane.xlu2 %192  ;;  %vm224_vm5 = vweird.f32 %v974_v37  ;;  %vm1086_vm6 = vmor %vm253_vm3, %vm254_vm4  ;;  %vm238_vm12 = vweird.f32 %v199_v39 }
 0x100   :  { %v250_v44 = vsub.f32 1.0, %v249_v38  ;;  %977 = vrcp.f32 %v1081_v43  ;;  %vm225_vm11 = vmor %vm223_vm7, %vm224_vm5  ;;  %v244_v63 = vand.u32 2147483648, %v199_v39  ;;  %v242_v1 = vand.u32 2147483647, %v199_v39 }
 0x101   :  { %v220_v46 = vsub.f32 1.0, %v219_v41  ;;  %v212_v8 = vand.u32 2147483647, %v1081_v43  ;;  %v214_v13 = vand.u32 2147483648, %v1081_v43  ;;  %vm208_vm2 = vweird.f32 %v1081_v43 }
 0x102   :  { %v251_v50 = vmul.f32 %v972_v36, %v250_v44  ;;  %v245_v12 = vor.u32 1.1754944e-38, %v244_v63  ;;  %vm243_vm0 = vcmp.eq.f32.partialorder %v242_v1, 8.507059e+37  ;;  %v290_v32 = vsel %vm165_vm1, %v1108_v10, 0 }
 0x103   :  { %v221_v51 = vmul.f32 %v974_v37, %v220_v46  ;;  %v215_v28 = vor.u32 1.1754944e-38, %v214_v13  ;;  %vm213_vm4 = vcmp.eq.f32.partialorder %v212_v8, 8.507059e+37  ;;  %v1144_v44 = vsub.f32 %v290_v32, %v290_v32 }
 0x104   :  { %v252_v54 = vadd.f32 %v972_v36, %v251_v50 }
 0x105   :  { %v976_v57 = vpop.eup %975  ;;  %v222_v58 = vadd.f32 %v974_v37, %v221_v51 }
 0x106   :  { %v978_v60 = vpop.eup %977  ;;  %v256_v61 = vsel %vm1086_vm6, %v972_v36, %v252_v54  ;;  %v234_v62 = vmul.f32 %v976_v57, %v199_v39  ;;  %vm239_vm13 = vweird.f32 %v976_v57  ;;  %v1155_v54 = vand.u32 4294901760, %v1144_v44 }
 0x107   :  { %v226_v0 = vsel %vm225_vm11, %v974_v37, %v222_v58  ;;  %v204_v2 = vmul.f32 %v978_v60, %v1081_v43  ;;  %v261_v3 = vsel %vm1090_vm8, %v260_v53, %v256_v61  ;;  %vm1113_vm14 = vmor %vm238_vm12, %vm239_vm13  ;;  %vm209_vm15 = vweird.f32 %v978_v60 }
 0x108   :  { %v231_v4 = vsel %vm228_vm9, %v230_v59, %v226_v0  ;;  %v235_v5 = vsub.f32 1.0, %v234_v62  ;;  %v262_v6 = vmul.f32 %v1053_v18, %v261_v3  ;;  %vm210_vm3 = vmor %vm208_vm2, %vm209_vm15  ;;  %v328_v43 = vsub.f32 %v1094_v56, %v1128_v26 }
 0x109   :  { %v205_v7 = vsub.f32 1.0, %v204_v2  ;;  %v232_v9 = vmul.f32 %v1055_v21, %v231_v4  ;;  %v266_v21 = vadd.s32 16, %v1069_v29  ;;  %v336_v61 = vsub.f32 %v1144_v44, %v1155_v54 }
 0x10a   :  { %v236_v11 = vmul.f32 %v976_v57, %v235_v5  ;;  %v594_v14 = vsel %vm165_vm1, %v262_v6, 0  ;;  %v1152_v52 = vand.u32 4294901760, %v328_v43  ;;  %v268_v3 = vadd.s32 32, %v1069_v29 }
 0x10b   :  { %v206_v16 = vmul.f32 %v978_v60, %v205_v7  ;;  %v305_v17 = vsel %vm165_vm1, %v232_v9, 0  ;;  %v1118_v18 = vand.u32 4294901760, %v594_v14  ;;  %vm273_vm5 = vcmp.eq.s32.totalorder %v266_v21, %v1071_v30  ;;  %v22_v21 = vld [vmem:[%s1470_s0 + $0x8] sm:$0xf] }
 0x10c   :  { %v237_v19 = vadd.f32 %v976_v57, %v236_v11  ;;  %v1120_v20 = vand.u32 4294901760, %v305_v17  ;;  %v1149_v49 = vsel %vm273_vm5, 1.0, %v1005_v33  ;;  %v1173_v4 = vand.u32 4294901760, %v336_v61 }
 0x10d   :  { %v207_v22 = vadd.f32 %v978_v60, %v206_v16  ;;  %v1125_v23 = vsub.f32 %v594_v14, %v1118_v18  ;;  %vm275_vm7 = vcmp.eq.s32.totalorder %v268_v3, %v1071_v30  ;;  %vm884_vm8 = vcmask 90112  }
 0x10e   :  { %v241_v27 = vsel %vm1113_vm14, %v976_v57, %v237_v19  ;;  %322 = vmatpush.xpose.msra.mxu0 %v1120_v20  ;;  %474 = vmatpush.xpose.msra.mxu3 %v1120_v20  ;;  %v381_v31 = vsub.f32 %v305_v17, %v1120_v20  ;;  %v293_v57 = vsel %vm165_vm1, %v1149_v49, 0  ;;  %v1192_v8 = vsel %vm275_vm7, 1.0, %v1005_v33  ;;  %v23_v17 = vld [vmem:[%s1470_s0 + $0x10] sm:$0xff]  ;;  %v21_v19 = vld [vmem:[%s1470_s0] sm:$0xff] }
 0x10f   :  { %v246_v34 = vsel %vm243_vm0, %v245_v12, %v241_v27  ;;  %v211_v36 = vsel %vm210_vm3, %v978_v60, %v207_v22  ;;  %v671_v37 = vand.u32 4294901760, %v1125_v23  ;;  %v1164_v62 = vsub.f32 %v293_v57, %v293_v57  ;;  %v24_v22 = vld [vmem:[%s1470_s0 + $0x18] sm:$0xf] }
 0x110   :  { %v216_v38 = vsel %vm213_vm4, %v215_v28, %v211_v36  ;;  %429 = vmatpush.xpose.msra.mxu2 %v381_v31  ;;  %v382_v39 = vand.u32 4294901760, %v381_v31  ;;  %v247_v40 = vmul.f32 %v1061_v24, %v246_v34  ;;  %v299_v11 = vsel %vm165_vm1, %v1192_v8, 0 }
 0x111   :  { %v217_v41 = vmul.f32 %v1063_v25, %v216_v38  ;;  %v672_v42 = vsub.f32 %v1125_v23, %v671_v37  ;;  %v267_v25 = vadd.s32 24, %v1069_v29  ;;  %v1176_v5 = vand.u32 4294901760, %v1164_v62 }
 0x112   :  { %v383_v45 = vsub.f32 %v381_v31, %v382_v39  ;;  %v591_v46 = vsel %vm165_vm1, %v247_v40, 0  ;;  %v1205_v12 = vsub.f32 %v299_v11, %v299_v11  ;;  %vm135_vm9 = vcmask 261120  }
 0x113   :  { %v302_v47 = vsel %vm165_vm1, %v217_v41, 0  ;;  %v612_v48 = vand.u32 4294901760, %v591_v46  ;;  %v673_v51 = vand.u32 4294901760, %v672_v42  ;;  %vm274_vm6 = vcmp.eq.s32.totalorder %v267_v25, %v1071_v30 }
 0x114   :  { %v323_v24 = vand.u32 4294901760, %v302_v47  ;;  %v384_v50 = vand.u32 4294901760, %v383_v45  ;;  %v1169_v1 = vsel %vm274_vm6, 1.0, %v1005_v33  ;;  %v344_v29 = vsub.f32 %v1164_v62, %v1176_v5 }
 0x115   :  { %v676_v53 = vsub.f32 %v591_v46, %v612_v48  ;;  %v296_v6 = vsel %vm165_vm1, %v1169_v1, 0  ;;  %v1210_v14 = vand.u32 4294901760, %v1205_v12  ;;  %vm156_vm11 = vcmask 261124  }
 0x116   :  { %324 = vmatpush.xpose.msra.mxu0 %v323_v24  ;;  %385 = vmatpush.xpose.msra.mxu1 %v384_v50  ;;  %v387_v55 = vsub.f32 %v302_v47, %v323_v24  ;;  %v1188_v7 = vsub.f32 %v296_v6, %v296_v6  ;;  %v345_v30 = vand.u32 4294901760, %v344_v29 }
 0x117   :  { %476 = vmatpush.xpose.msra.mxu3 %v323_v24  ;;  %v677_v58 = vand.u32 4294901760, %v676_v53  ;;  %v360_v15 = vsub.f32 %v1205_v12, %v1210_v14 }
 0x118   :  { %432 = vmatpush.xpose.msra.mxu2 %v387_v55  ;;  %v388_v59 = vand.u32 4294901760, %v387_v55  ;;  %v1197_v9 = vand.u32 4294901760, %v1188_v7 }
 0x119   :  { %330 = vmatmul.f32.vlgmr.msra.gmra.mxu0 %v1152_v52  ;;  %v678_v60 = vsub.f32 %v676_v53, %v677_v58  ;;  %v361_v16 = vand.u32 4294901760, %v360_v15 }
 0x11a   :  { %525 = vmatpush.xpose.msrb.mxu0 %v382_v39  ;;  %480 = vmatmul.f32.vlgmr.msra.gmra.mxu3 %v1128_v26  ;;  %v389_v63 = vsub.f32 %v387_v55, %v388_v59  ;;  %v352_v33 = vsub.f32 %v1188_v7, %v1197_v9 }
 0x11b   :  { %674 = vmatpush.xpose.msrb.mxu3 %v673_v51  ;;  %435 = vmatmul.f32.vlgmr.msra.gmra.mxu2 %v1094_v56  ;;  %v679_v0 = vand.u32 4294901760, %v678_v60 }
 0x11c   :  { %611 = vmatpush.xpose.msrb.mxu2 %v1118_v18  ;;  %v390_v2 = vand.u32 4294901760, %v389_v63  ;;  %v353_v13 = vand.u32 4294901760, %v352_v33 }
 0x11e   :  { %529 = vmatpush.xpose.msrb.mxu0 %v388_v59  ;;  %391 = vmatpush.xpose.msra.mxu1 %v390_v2 }
 0x11f   :  { %680 = vmatpush.xpose.msrb.mxu3 %v679_v0 }
 0x120   :  { %613 = vmatpush.xpose.msrb.mxu2 %v612_v48 }
 0x121   :  { %338 = vmatmul.f32.gmra.mxu0 %v1173_v4  ;;  %918 = vmatmul.msk.f32.vlgmr.msra.gmra.mxu1 %vm165_vm1, %v1077_v35 }
 0x122   :  { %718 = vmatpush.xpose.msra.mxu0 %v1125_v23  ;;  %566 = vmatpush.xpose.msrb.mxu1 %v1120_v20  ;;  %v1007_v20 = vmov 1   ;;  %v1008_v23 = vmov 2  }
 0x123   :  { %855 = vmatpush.xpose.msra.mxu3 %v1118_v18  ;;  %440 = vmatmul.f32.gmra.mxu2 %v1144_v44 }
 0x124   :  { %814 = vmatpush.xpose.msra.mxu2 %v671_v37  ;;  %486 = vmatmul.f32.gmra.mxu3 %v1155_v54 }
 0x126   :  { %721 = vmatpush.xpose.msra.mxu0 %v676_v53  ;;  %568 = vmatpush.xpose.msrb.mxu1 %v323_v24  ;;  %v18_v24 = vld [vmem:[%s1471_s1 + $0x8] sm:$0xff] }
 0x127   :  { %857 = vmatpush.xpose.msra.mxu3 %v612_v48  ;;  %v1330_v25 = vperm.slane %v18_v24, 1  ;;  %v1334_v53 = vperm.slane %v18_v24, 0 }
 0x128   :  { %818 = vmatpush.xpose.msra.mxu2 %v677_v58 }
 0x129   :  { %346 = vmatmul.f32.gmra.mxu0 %v345_v30  ;;  %919 = vmatmul.msk.f32.gmra.mxu1 %vm165_vm1, %v1108_v10 }
 0x12a   :  { %763 = vmatpush.xpose.msra.mxu1 %v1118_v18  ;;  %v1006_v18 = vmov 0  }
 0x12b   :  { %445 = vmatmul.f32.gmra.mxu2 %v1164_v62  ;;  %957 = vset.pattern.permute.xlu1 %v1006_v18 }
 0x12c   :  { %492 = vmatmul.f32.gmra.mxu3 %v1176_v5  ;;  %955 = vset.pattern.permute.xlu2 %v1006_v18 }
 0x12d   :  { %37 = vperm.xlu1 %957, %v23_v17   ;;  %956 = vset.pattern.permute.xlu0 %v1006_v18 }
 0x12e   :  { %765 = vmatpush.xpose.msra.mxu1 %v612_v48  ;;  %27 = vperm.xlu2 %955, %v21_v19  }
 0x12f   :  { %32 = vperm.xlu0 %956, %v22_v21  }
 0x131   :  { %354 = vmatmul.f32.gmra.mxu0 %v353_v13  ;;  %920 = vmatmul.msk.f32.gmra.mxu1 %vm165_vm1, %v1149_v49 }
 0x133   :  { %450 = vmatmul.f32.gmra.mxu2 %v1188_v7 }
 0x134   :  { %498 = vmatmul.f32.gmra.mxu3 %v1197_v9 }
 0x135   :  { %959 = vset.pattern.permute.xlu1 %v1007_v20 }
 0x136   :  { %60 = vperm.xlu1 %959, %v22_v21   ;;  %42 = vperm.xlu2 %955, %v24_v22  }
 0x137   :  { %960 = vset.pattern.permute.xlu0 %v1008_v23 }
 0x138   :  { %90 = vperm.xlu0 %960, %v21_v19  }
 0x139   :  { %362 = vmatmul.f32.gmra.mxu0 %v361_v16  ;;  %921 = vmatmul.msk.f32.gmra.mxu1 %vm165_vm1, %v1169_v1 }
 0x13b   :  { %455 = vmatmul.f32.gmra.mxu2 %v1205_v12 }
 0x13c   :  { %504 = vmatmul.f32.gmra.mxu3 %v1210_v14 }
 0x13e   :  { %68 = vperm.xlu1 %959, %v24_v22   ;;  %958 = vset.pattern.permute.xlu2 %v1007_v20 }
 0x13f   :  { %56 = vperm.xlu2 %958, %v21_v19  }
 0x141   :  { %922 = vmatmul.msk.f32.gmra.mxu1 %vm165_vm1, %v1192_v8  ;;  %923 = vmatmul.msk.f32.vlgmr.msrb.gmra.mxu0 %vm165_vm1, %v1077_v35 }
 0x143   :  { %619 = vmatmul.f32.vlgmr.msrb.gmra.mxu2 %v1152_v52 }
 0x144   :  { %933 = vmatmul.msk.f32.vlgmr.msrb.gmra.mxu3 %vm165_vm1, %v1077_v35 }
 0x146   :  { %962 = vset.pattern.permute.xlu1 %v1008_v23 }
 0x147   :  { %98 = vperm.xlu1 %962, %v23_v17   ;;  %64 = vperm.xlu2 %958, %v23_v17  }
 0x149   :  { %924 = vmatmul.msk.f32.gmra.mxu0 %vm165_vm1, %v1108_v10  ;;  %928 = vmatmul.msk.f32.vlgmr.msrb.gmra.mxu1 %vm165_vm1, %v1077_v35 }
 0x14b   :  { %627 = vmatmul.f32.gmra.mxu2 %v1173_v4 }
 0x14c   :  { %934 = vmatmul.msk.f32.gmra.mxu3 %vm165_vm1, %v1108_v10 }
 0x14f   :  { %961 = vset.pattern.permute.xlu2 %v1008_v23 }
 0x150   :  { %94 = vperm.xlu2 %961, %v22_v21  }
 0x151   :  { %925 = vmatmul.msk.f32.gmra.mxu0 %vm165_vm1, %v1149_v49  ;;  %929 = vmatmul.msk.f32.gmra.mxu1 %vm165_vm1, %v1108_v10 }
 0x153   :  { %635 = vmatmul.f32.gmra.mxu2 %v345_v30 }
 0x154   :  { %935 = vmatmul.msk.f32.gmra.mxu3 %vm165_vm1, %v1149_v49 }
 0x158   :  { %102 = vperm.xlu2 %961, %v24_v22  }
 0x159   :  { %926 = vmatmul.msk.f32.gmra.mxu0 %vm165_vm1, %v1169_v1  ;;  %930 = vmatmul.msk.f32.gmra.mxu1 %vm165_vm1, %v1149_v49 }
 0x15b   :  { %643 = vmatmul.f32.gmra.mxu2 %v353_v13 }
 0x15c   :  { %936 = vmatmul.msk.f32.gmra.mxu3 %vm165_vm1, %v1169_v1 }
 0x161   :  { %927 = vmatmul.msk.f32.gmra.mxu0 %vm165_vm1, %v1192_v8  ;;  %931 = vmatmul.msk.f32.gmra.mxu1 %vm165_vm1, %v1169_v1 }
 0x163   :  { %651 = vmatmul.f32.gmra.mxu2 %v361_v16 }
 0x164   :  { %937 = vmatmul.msk.f32.gmra.mxu3 %vm165_vm1, %v1192_v8 }
 0x169   :  { %932 = vmatmul.msk.f32.gmra.mxu1 %vm165_vm1, %v1192_v8  ;;  %724 = vmatmul.f32.vlgmr.msra.gmra.mxu0 %v1094_v56 }
 0x16b   :  { %938 = vmatmul.msk.f32.vlgmr.msra.gmra.mxu2 %vm165_vm1, %v1077_v35 }
 0x16c   :  { %943 = vmatmul.msk.f32.vlgmr.msra.gmra.mxu3 %vm165_vm1, %v1077_v35 }
 0x171   :  { %729 = vmatmul.f32.gmra.mxu0 %v1144_v44  ;;  %769 = vmatmul.f32.vlgmr.msra.gmra.mxu1 %v1128_v26 }
 0x173   :  { %939 = vmatmul.msk.f32.gmra.mxu2 %vm165_vm1, %v1108_v10 }
 0x174   :  { %944 = vmatmul.msk.f32.gmra.mxu3 %vm165_vm1, %v1108_v10 }
 0x179   :  { %734 = vmatmul.f32.gmra.mxu0 %v1164_v62  ;;  %775 = vmatmul.f32.gmra.mxu1 %v1155_v54 }
 0x17b   :  { %940 = vmatmul.msk.f32.gmra.mxu2 %vm165_vm1, %v1149_v49 }
 0x17c   :  { %945 = vmatmul.msk.f32.gmra.mxu3 %vm165_vm1, %v1149_v49  ;;  %v17_v49 = vld [vmem:[%s1471_s1] sm:$0xff] }
 0x17d   :  { %v1328_v51 = vperm.slane %v17_v49, 1  ;;  %v1332_v52 = vperm.slane %v17_v49, 0  ;;  %v1344_v0 = vperm.slane %v17_v49, 2  ;;  %v1356_v13 = vperm.slane %v17_v49, 3 }
 0x181   :  { %739 = vmatmul.f32.gmra.mxu0 %v1188_v7  ;;  %781 = vmatmul.f32.gmra.mxu1 %v1176_v5 }
 0x183   :  { %941 = vmatmul.msk.f32.gmra.mxu2 %vm165_vm1, %v1169_v1 }
 0x184   :  { %946 = vmatmul.msk.f32.gmra.mxu3 %vm165_vm1, %v1169_v1  ;;  %v1346_v1 = vperm.slane %v18_v24, 2 }
 0x188   :  { %v28_v56 = vpop.permute.xlu2 %27 }
 0x189   :  { %744 = vmatmul.f32.gmra.mxu0 %v1205_v12  ;;  %787 = vmatmul.f32.gmra.mxu1 %v1197_v9  ;;  %v48_v30 = vmul.f32 %v1334_v53, %v28_v56 }
 0x18b   :  { %942 = vmatmul.msk.f32.gmra.mxu2 %vm165_vm1, %v1192_v8 }
 0x18c   :  { %947 = vmatmul.msk.f32.gmra.mxu3 %vm165_vm1, %v1192_v8  ;;  %v47_v8 = vmul.f32 %v1332_v52, %v28_v56  ;;  %vm879_vm1 = vcmask 97280  }
 0x190   :  { %v43_v32 = vpop.permute.xlu2 %42 }
 0x191   :  { %793 = vmatmul.f32.gmra.mxu1 %v1210_v14  ;;  %v1358_v14 = vperm.slane %v18_v24, 3  ;;  %v53_v17 = vmul.f32 %v1332_v52, %v43_v32  ;;  %v54_v18 = vmul.f32 %v1334_v53, %v43_v32 }
 0x196   :  { %v331_v35 = vpop.f32.mrf.mxu0 }
 0x199   :  { %v57_v42 = vpop.permute.xlu2 %56 }
 0x19a   :  { %v73_v9 = vmul.f32 %v1328_v51, %v57_v42  ;;  %v74_v11 = vmul.f32 %v1330_v25, %v57_v42 }
 0x19d   :  { %v481_v10 = vpop.f32.mrf.mxu3 }
 0x19e   :  { %v339_v26 = vpop.f32.mrf.mxu0  ;;  %v394_v27 = vpop.f32.mrf.mxu1 }
 0x19f   :  { %v436_v28 = vpop.f32.mrf.mxu2  ;;  %v1310_v43 = vpop.permute.xlu1 %37  ;;  %v395_v50 = vadd.f32 %v394_v27, %v331_v35 }
 0x1a1   :  { %v1320_v48 = vpop.permute.xlu2 %64  ;;  %v33_v59 = vpop.permute.xlu0 %32  ;;  %v437_v2 = vadd.f32 %v436_v28, %v395_v50 }
 0x1a2   :  { %v49_v62 = vmul.f32 %v1332_v52, %v33_v59  ;;  %v50_v63 = vmul.f32 %v1334_v53, %v33_v59 }
 0x1a3   :  { %v482_v15 = vadd.f32 %v481_v10, %v437_v2  ;;  %v81_v10 = vadd.f32 %v73_v9, %v47_v8 }
 0x1a6   :  { %v1300_v34 = vpop.f32.mrf.mxu0  ;;  %v398_v36 = vpop.f32.mrf.mxu1 }
 0x1a7   :  { %v1298_v31 = vpop.f32.mrf.mxu3  ;;  %v441_v37 = vpop.f32.mrf.mxu2  ;;  %v399_v16 = vadd.f32 %v398_v36, %v339_v26  ;;  %v82_v26 = vadd.f32 %v74_v11, %v48_v30 }
 0x1a8   :  { %v61_v54 = vpop.permute.xlu1 %60 }
 0x1a9   :  { %v75_v57 = vmul.f32 %v1328_v51, %v61_v54  ;;  %v76_v58 = vmul.f32 %v1330_v25, %v61_v54  ;;  %v442_v36 = vadd.f32 %v441_v37, %v399_v16  ;;  %v77_v16 = vmul.f32 %v1328_v51, %v1320_v48 }
 0x1aa   :  { %v95_v4 = vpop.permute.xlu2 %94  ;;  %v91_v50 = vpop.permute.xlu0 %90 }
 0x1ab   :  { %v83_v5 = vadd.f32 %v75_v57, %v49_v62  ;;  %v84_v6 = vadd.f32 %v76_v58, %v50_v63  ;;  %v109_v29 = vmul.f32 %v1344_v0, %v95_v4  ;;  %v110_v7 = vmul.f32 %v1346_v1, %v95_v4 }
 0x1ac   :  { %v107_v54 = vmul.f32 %v1344_v0, %v91_v50  ;;  %v108_v57 = vmul.f32 %v1346_v1, %v91_v50  ;;  %v488_v63 = vadd.f32 %v1298_v31, %v442_v36 }
 0x1ad   :  { %v117_v33 = vadd.f32 %v109_v29, %v83_v5  ;;  %v118_v12 = vadd.f32 %v110_v7, %v84_v6 }
 0x1ae   :  { %v1304_v39 = vpop.f32.mrf.mxu0  ;;  %v1306_v40 = vpop.f32.mrf.mxu1  ;;  %v116_v62 = vadd.f32 %v108_v57, %v82_v26 }
 0x1af   :  { %v1302_v38 = vpop.f32.mrf.mxu3  ;;  %v1308_v41 = vpop.f32.mrf.mxu2  ;;  %v127_v19 = vadd.f32 %v1356_v13, %v117_v33  ;;  %v128_v20 = vadd.f32 %v1358_v14, %v118_v12  ;;  %v403_v2 = vadd.f32 %v1306_v40, %v1300_v34  ;;  %v51_v40 = vmul.f32 %v1332_v52, %v1310_v43 }
 0x1b0   :  { %v69_v21 = vpop.permute.xlu1 %68  ;;  %v126_v29 = vadd.f32 %v1358_v14, %v116_v62 }
 0x1b1   :  { %v79_v35 = vmul.f32 %v1328_v51, %v69_v21  ;;  %v80_v56 = vmul.f32 %v1330_v25, %v69_v21  ;;  %137 = vst [vmem:[#allocation2 + $0x18] sm:$0xf] %v127_v19  ;;  %v447_v31 = vadd.f32 %v1308_v41, %v403_v2 }
 0x1b2   :  { %138 = vst [vmem:[#allocation2 + $0x20] sm:$0xf] %v128_v20  ;;  %v103_v58 = vpop.permute.xlu2 %102 }
 0x1b3   :  { %v87_v49 = vadd.f32 %v79_v35, %v53_v17  ;;  %v88_v24 = vadd.f32 %v80_v56, %v54_v18  ;;  %v113_v59 = vmul.f32 %v1344_v0, %v103_v58  ;;  %v114_v37 = vmul.f32 %v1346_v1, %v103_v58  ;;  %134 = vst [vmem:[#allocation2 + $0x8] sm:$0xff] %v126_v29 }
 0x1b4   :  { %v78_v17 = vmul.f32 %v1330_v25, %v1320_v48  ;;  %v494_v41 = vadd.f32 %v1302_v38, %v447_v31  ;;  %v85_v18 = vadd.f32 %v77_v16, %v51_v40 }
 0x1b5   :  { %v121_v4 = vadd.f32 %v113_v59, %v87_v49  ;;  %v122_v5 = vadd.f32 %v114_v37, %v88_v24 }
 0x1b6   :  { %v1314_v45 = vpop.f32.mrf.mxu0  ;;  %v1316_v46 = vpop.f32.mrf.mxu1 }
 0x1b7   :  { %v1312_v44 = vpop.f32.mrf.mxu3  ;;  %v1318_v47 = vpop.f32.mrf.mxu2  ;;  %v131_v30 = vadd.f32 %v1356_v13, %v121_v4  ;;  %v132_v33 = vadd.f32 %v1358_v14, %v122_v5  ;;  %v407_v52 = vadd.f32 %v1316_v46, %v1304_v39  ;;  %v19_v5 = vld [vmem:[%s1471_s1 + $0x10] sm:$0xff] }
 0x1b8   :  { %136 = vst.msk [vmem:[#allocation2 + $0x10] sm:$0xff] %vm135_vm9, %v19_v5 }
 0x1b9   :  { %144 = vst [vmem:[#allocation2 + $0x48] sm:$0xf] %v131_v30  ;;  %v99_v51 = vpop.permute.xlu1 %98 }
 0x1ba   :  { %145 = vst [vmem:[#allocation2 + $0x50] sm:$0xf] %v132_v33  ;;  %v111_v25 = vmul.f32 %v1344_v0, %v99_v51  ;;  %v112_v21 = vmul.f32 %v1346_v1, %v99_v51 }
 0x1bb   :  { %143 = vst.msk [vmem:[#allocation2 + $0x40] sm:$0xff] %vm135_vm9, %v19_v5 }
 0x1bc   :  { %v119_v38 = vadd.f32 %v111_v25, %v85_v18 }
 0x1be   :  { %v1340_v60 = vpop.f32.mrf.mxu1  ;;  %v532_v61 = vpop.f32.mrf.mxu0  ;;  %v129_v39 = vadd.f32 %v1356_v13, %v119_v38 }
 0x1bf   :  { %v1336_v55 = vpop.f32.mrf.mxu3  ;;  %v1348_v3 = vpop.f32.mrf.mxu2  ;;  %v533_v22 = vadd.f32 %v532_v61, %v482_v15  ;;  %v115_v61 = vadd.f32 %v107_v54, %v81_v10  ;;  %v52_v15 = vmul.f32 %v1334_v53, %v1310_v43  ;;  %v411_v0 = vadd.f32 %v1340_v60, %v1314_v45 }
 0x1c0   :  { %141 = vst [vmem:[#allocation2 + $0x30] sm:$0xff] %v129_v39 }
 0x1c1   :  { %v125_v6 = vadd.f32 %v1356_v13, %v115_v61  ;;  %v86_v43 = vadd.f32 %v78_v17, %v52_v15  ;;  %v457_v36 = vadd.f32 %v1348_v3, %v411_v0  ;;  %v20_v61 = vld [vmem:[%s1471_s1 + $0x28] sm:$0xff]  ;;  %s1010_s1 = smov 384  }
 0x1c2   :  { %140 = vst.msk [vmem:[#allocation2 + $0x28] sm:$0xf] %vm139_vm10, %v20_v61 }
 0x1c3   :  { %133 = vst [vmem:[#allocation2] sm:$0xff] %v125_v6 }
 0x1c4   :  { %146 = vst.msk [vmem:[#allocation2 + $0x58] sm:$0xf] %vm139_vm10, %v20_v61 }
 0x1c6   :  { %v536_v27 = vpop.f32.mrf.mxu0  ;;  %v571_v28 = vpop.f32.mrf.mxu1 }
 0x1c7   :  { %v1364_v23 = vpop.f32.mrf.mxu3  ;;  %v572_v32 = vadd.f32 %v571_v28, %v533_v22  ;;  %v1368_v42 = vpop.f32.mrf.mxu2  ;;  %v537_v7 = vadd.f32 %v536_v27, %v488_v63  ;;  %v452_v22 = vadd.f32 %v1318_v47, %v407_v52  ;;  %v120_v27 = vadd.f32 %v112_v21, %v86_v43 }
 0x1c8   :  { %v684_v3 = vadd.f32 %v1364_v23, %v1368_v42  ;;  %v148_v63 = vrot.slane %v20_v61, 4 }
 0x1c9   :  { %880 = vst.msk [vmem:[%s1474_s4] sm:$0xff] %vm879_vm1, %v572_v32  ;;  %v130_v46 = vadd.f32 %v1358_v14, %v120_v27  ;;  %v500_v28 = vadd.f32 %v1312_v44, %v452_v22  ;;  %v506_v44 = vadd.f32 %v1336_v55, %v457_v36 }
 0x1cb   :  { %142 = vst [vmem:[#allocation2 + $0x38] sm:$0xff] %v130_v46 }
 0x1ce   :  { %v540_v9 = vpop.f32.mrf.mxu0  ;;  %v575_v11 = vpop.f32.mrf.mxu1 }
 0x1cf   :  { %v1383_v8 = vpop.f32.mrf.mxu3  ;;  %v576_v12 = vadd.f32 %v575_v11, %v537_v7  ;;  %v628_v34 = vpop.f32.mrf.mxu2  ;;  %v541_v53 = vadd.f32 %v540_v9, %v494_v41  ;;  %v151_v7 = vrot.slane %v148_v63, 4 }
 0x1d0   :  { %v688_v2 = vadd.f32 %v1383_v8, %v628_v34 }
 0x1d1   :  { %881 = vst.msk [vmem:[%s1474_s4 + $0x8] sm:$0xff] %vm879_vm1, %v576_v12 }
 0x1d2   :  { %157 = vst.msk [vmem:[#allocation2 + $0x28] sm:$0xf0] %vm156_vm11, %v151_v7 }
 0x1d3   :  { %160 = vst.msk [vmem:[#allocation2 + $0x58] sm:$0xf0] %vm156_vm11, %v151_v7 }
 0x1d4   :  { %903 = dma.vmem_to_hbm [thread:$0]  %s896_s23, 1536, %s898_s26, [#allocation3], %s1010_s1, %s1010_s1, %s1011_s3  }
 0x1d6   :  { %v544_v20 = vpop.f32.mrf.mxu0  ;;  %v579_v48 = vpop.f32.mrf.mxu1 }
 0x1d7   :  { %v1403_v19 = vpop.f32.mrf.mxu3  ;;  %v580_v35 = vadd.f32 %v579_v48, %v541_v53  ;;  %v636_v56 = vpop.f32.mrf.mxu2  ;;  %v545_v47 = vadd.f32 %v544_v20, %v500_v28 }
 0x1d8   :  { %v692_v11 = vadd.f32 %v1403_v19, %v636_v56 }
 0x1d9   :  { %882 = vst.msk [vmem:[%s1474_s4 + $0x10] sm:$0xff] %vm879_vm1, %v580_v35 }
 0x1de   :  { %v548_v10 = vpop.f32.mrf.mxu0  ;;  %v583_v26 = vpop.f32.mrf.mxu1 }
 0x1df   :  { %v1417_v1 = vpop.f32.mrf.mxu3  ;;  %v584_v32 = vadd.f32 %v583_v26, %v545_v47  ;;  %v644_v49 = vpop.f32.mrf.mxu2  ;;  %v549_v13 = vadd.f32 %v548_v10, %v506_v44 }
 0x1e0   :  { %v696_v41 = vadd.f32 %v1417_v1, %v644_v49 }
 0x1e1   :  { %883 = vst.msk [vmem:[%s1474_s4 + $0x18] sm:$0xff] %vm879_vm1, %v584_v32 }
 0x1e6   :  { %v587_v60 = vpop.f32.mrf.mxu1  ;;  %v725_v14 = vpop.f32.mrf.mxu0 }
 0x1e7   :  { %v1425_v45 = vpop.f32.mrf.mxu3  ;;  %v588_v24 = vadd.f32 %v587_v60, %v549_v13  ;;  %v652_v50 = vpop.f32.mrf.mxu2  ;;  %v726_v54 = vadd.f32 %v725_v14, %v684_v3 }
 0x1e8   :  { %v700_v25 = vadd.f32 %v1425_v45, %v652_v50 }
 0x1e9   :  { %885 = vst.msk [vmem:[%s1474_s4 + $0x20] sm:$0x1] %vm884_vm8, %v588_v24 }
 0x1ee   :  { %v730_v58 = vpop.f32.mrf.mxu0  ;;  %v770_v55 = vpop.f32.mrf.mxu1 }
 0x1ef   :  { %v860_v57 = vpop.f32.mrf.mxu3  ;;  %v771_v59 = vadd.f32 %v770_v55, %v726_v54  ;;  %v821_v37 = vpop.f32.mrf.mxu2  ;;  %v731_v23 = vadd.f32 %v730_v58, %v688_v2 }
 0x1f1   :  { %v822_v62 = vadd.f32 %v821_v37, %v771_v59 }
 0x1f3   :  { %v861_v4 = vadd.f32 %v860_v57, %v822_v62 }
 0x1f5   :  { %886 = vst.msk [vmem:[%s1474_s4 + $0x28] sm:$0xff] %vm879_vm1, %v861_v4 }
 0x1f6   :  { %v735_v6 = vpop.f32.mrf.mxu0  ;;  %v776_v29 = vpop.f32.mrf.mxu1 }
 0x1f7   :  { %v864_v42 = vpop.f32.mrf.mxu3  ;;  %v777_v8 = vadd.f32 %v776_v29, %v731_v23  ;;  %v825_v30 = vpop.f32.mrf.mxu2  ;;  %v736_v31 = vadd.f32 %v735_v6, %v692_v11 }
 0x1f9   :  { %v826_v9 = vadd.f32 %v825_v30, %v777_v8 }
 0x1fb   :  { %v865_v33 = vadd.f32 %v864_v42, %v826_v9 }
 0x1fd   :  { %887 = vst.msk [vmem:[%s1474_s4 + $0x30] sm:$0xff] %vm879_vm1, %v865_v33 }
 0x1fe   :  { %v782_v34 = vpop.f32.mrf.mxu1  ;;  %v740_v16 = vpop.f32.mrf.mxu0 }
 0x1ff   :  { %v868_v12 = vpop.f32.mrf.mxu3  ;;  %v783_v40 = vadd.f32 %v782_v34, %v736_v31  ;;  %v829_v15 = vpop.f32.mrf.mxu2  ;;  %v741_v18 = vadd.f32 %v740_v16, %v696_v41 }
 0x201   :  { %v830_v17 = vadd.f32 %v829_v15, %v783_v40 }
 0x203   :  { %v869_v52 = vadd.f32 %v868_v12, %v830_v17 }
 0x205   :  { %888 = vst.msk [vmem:[%s1474_s4 + $0x38] sm:$0xff] %vm879_vm1, %v869_v52 }
 0x206   :  { %v788_v43 = vpop.f32.mrf.mxu1  ;;  %v745_v48 = vpop.f32.mrf.mxu0 }
 0x207   :  { %v872_v53 = vpop.f32.mrf.mxu3  ;;  %v789_v19 = vadd.f32 %v788_v43, %v741_v18  ;;  %v833_v51 = vpop.f32.mrf.mxu2  ;;  %v746_v22 = vadd.f32 %v745_v48, %v700_v25 }
 0x209   :  { %v834_v20 = vadd.f32 %v833_v51, %v789_v19 }
 0x20b   :  { %v873_v21 = vadd.f32 %v872_v53, %v834_v20 }
 0x20d   :  { %889 = vst.msk [vmem:[%s1474_s4 + $0x40] sm:$0xff] %vm879_vm1, %v873_v21 }
 0x20e   :  { %v794_v35 = vpop.f32.mrf.mxu1 }
 0x20f   :  { %v795_v56 = vadd.f32 %v794_v35, %v746_v22  ;;  %v837_v38 = vpop.f32.mrf.mxu2  ;;  %v876_v27 = vpop.f32.mrf.mxu3 }
 0x211   :  { %v838_v39 = vadd.f32 %v837_v38, %v795_v56 }
 0x213   :  { %v877_v46 = vadd.f32 %v876_v27, %v838_v39 }
 0x215   :  { %890 = vst.msk [vmem:[%s1474_s4 + $0x48] sm:$0x1] %vm884_vm8, %v877_v46 }
 0x216   :  { %1003 = dma.done.wait [#allocation3], 1536  }
 0x217   :  { %1004 = vsyncadd [#allocation3], 4294965760 }
 0x218   :  { %912 = vsyncpa [#allocation3], 1 }

</bundles_post_ra>
